<compile_context>
chip_gen: v7x
topology: tpu7x:2x2x1
jax: 0.10.0
libtpu: 0.0.40
codegen_flags: <defaults>
</compile_context>

<pallas_src>
import jax
import jax.numpy as jnp
from jax.experimental import pallas as pl
from jax.experimental.pallas import tpu as pltpu


def _row_chunks(n_rows: int, row_bytes: int) -> list[tuple[int, int]]:
    """Static (start_row, num_rows) chunks for overlapped HBM->HBM DMAs.

    Full rows of the (n, flat) slab are contiguous in HBM, so each chunk is a
    single linear DMA.  A handful of in-flight DMAs is enough to saturate HBM
    bandwidth on all generations; more would only add issue overhead.
    """
    total_bytes = n_rows * row_bytes
    if total_bytes >= (8 << 20):
        want = 8
    elif total_bytes >= (1 << 20):
        want = 4
    else:
        want = 2
    nchunks = max(1, min(want, n_rows))
    base, rem = divmod(n_rows, nchunks)
    chunks, start = [], 0
    for c in range(nchunks):
        size = base + (1 if c < rem else 0)
        chunks.append((start, size))
        start += size
    return chunks


def _make_hbm_copy_kernel(chunks):
    """Kernel that copies (n, flat) HBM -> HBM via chunked async DMAs."""

    def kernel(x_hbm, o_hbm, sems):
        copies = []
        # Start all chunk DMAs first so they overlap across DMA queues.
        for c, (start, size) in enumerate(chunks):
            cp = pltpu.make_async_copy(
                x_hbm.at[pl.ds(start, size), :],
                o_hbm.at[pl.ds(start, size), :],
                sems.at[c],
            )
            cp.start()
            copies.append(cp)
        for cp in copies:
            cp.wait()

    return kernel


def flatten(x: jax.Array, *, force_copy: bool = False, donate: bool = False) -> jax.Array:
    """Pallas equivalent of `x.view(x.size(0), -1)`.

    Default: metadata-only reshape (no kernel, no HBM traffic).
    force_copy=True: materialize the result with a direct HBM->HBM DMA copy.
    donate=True (with force_copy): alias the output onto the input buffer.
    """
    assert x.ndim >= 1, "flatten expects at least a batch dimension"
    n = x.shape[0]
    flat = 1
    for d in x.shape[1:]:
        flat *= d

    # Metadata-only on a contiguous row-major array; matches torch's .view.
    x2d = x.reshape(n, flat)

    if not force_copy or n == 0 or flat == 0:
        # Fast path (and degenerate-shape guard): the reshape IS the op.
        return x2d

    itemsize = jnp.dtype(x2d.dtype).itemsize
    chunks = _row_chunks(n, flat * itemsize)

    cost = pl.CostEstimate(
        flops=0,
        transcendentals=0,
        bytes_accessed=2 * n * flat * itemsize,
    )

    extra = {}
    if donate:
        # Output reuses the input's HBM buffer (value-preserving op); the DMA
        # then degenerates to a self-copy and XLA may elide it with donation.
        extra["input_output_aliases"] = {0: 0}

    return pl.pallas_call(
        _make_hbm_copy_kernel(chunks),
        out_shape=jax.ShapeDtypeStruct((n, flat), x2d.dtype),
        in_specs=[pl.BlockSpec(memory_space=pl.ANY)],
        out_specs=pl.BlockSpec(memory_space=pl.ANY),
        scratch_shapes=[pltpu.SemaphoreType.DMA((len(chunks),))],
        cost_estimate=cost,
        **extra,
    )(x2d)


if __name__ == "__main__":
    key = jax.random.PRNGKey(0)
    # Small NCHW input consistent with how Flatten is used after convs.
    x = jax.random.normal(key, (2, 4, 16, 16), dtype=jnp.float32)
    ref = x.reshape(x.shape[0], -1)

    # Default fast path: metadata-only reshape (the recommended usage).
    out_fast = jax.block_until_ready(flatten(x))

    # Explicit-copy path: exercises the Pallas HBM->HBM DMA kernel once.
    out_copy = jax.block_until_ready(flatten(x, force_copy=True))

    for out in (out_fast, out_copy):
        assert out.shape == ref.shape, (out.shape, ref.shape)
        assert out.dtype == ref.dtype, (out.dtype, ref.dtype)
        assert bool(jnp.array_equal(out, ref)), "flatten output mismatch"

    print("KERNEL_OK")
</pallas_src>

<mosaic_0001>
module attributes {stable_mosaic.version = 11 : i64} {
  func.func @kernel(%arg0: memref<2x1024xf32, #tpu.memory_space<any>>, %arg1: memref<2x1024xf32, #tpu.memory_space<any>>, %arg2: memref<2x!tpu.dma_semaphore, #tpu.memory_space<semaphore_mem>>) attributes {dimension_semantics = [], scalar_prefetch = 0 : i64, scratch_operands = 1 : i64, tpu.core_type = #tpu.core_type<tc>} {
    %c0_i32 = arith.constant 0 : i32
    %c0_i32_0 = arith.constant 0 : i32
    %c0_i32_1 = arith.constant 0 : i32
    %0 = tpu.memref_slice %arg0[%c0_i32_0, %c0_i32_1] : memref<2x1024xf32, #tpu.memory_space<any>> -> memref<1x1024xf32, #tpu.memory_space<any>>
    %c0_i32_2 = arith.constant 0 : i32
    %c0_i32_3 = arith.constant 0 : i32
    %1 = tpu.memref_slice %arg1[%c0_i32_2, %c0_i32_3] : memref<2x1024xf32, #tpu.memory_space<any>> -> memref<1x1024xf32, #tpu.memory_space<any>>
    %2 = tpu.memref_slice %arg2[%c0_i32] : memref<2x!tpu.dma_semaphore, #tpu.memory_space<semaphore_mem>> -> memref<1x!tpu.dma_semaphore, #tpu.memory_space<semaphore_mem>>
    %3 = tpu.memref_squeeze %2 : memref<1x!tpu.dma_semaphore, #tpu.memory_space<semaphore_mem>> -> memref<!tpu.dma_semaphore, #tpu.memory_space<semaphore_mem>>
    tpu.enqueue_dma source(%0 : memref<1x1024xf32, #tpu.memory_space<any>>) target(%1 : memref<1x1024xf32, #tpu.memory_space<any>>) target_semaphore(%3 : memref<!tpu.dma_semaphore, #tpu.memory_space<semaphore_mem>>)
    %c1_i32 = arith.constant 1 : i32
    %c1_i32_4 = arith.constant 1 : i32
    %c0_i32_5 = arith.constant 0 : i32
    %4 = tpu.memref_slice %arg0[%c1_i32_4, %c0_i32_5] : memref<2x1024xf32, #tpu.memory_space<any>> -> memref<1x1024xf32, #tpu.memory_space<any>>
    %c1_i32_6 = arith.constant 1 : i32
    %c0_i32_7 = arith.constant 0 : i32
    %5 = tpu.memref_slice %arg1[%c1_i32_6, %c0_i32_7] : memref<2x1024xf32, #tpu.memory_space<any>> -> memref<1x1024xf32, #tpu.memory_space<any>>
    %6 = tpu.memref_slice %arg2[%c1_i32] : memref<2x!tpu.dma_semaphore, #tpu.memory_space<semaphore_mem>> -> memref<1x!tpu.dma_semaphore, #tpu.memory_space<semaphore_mem>>
    %7 = tpu.memref_squeeze %6 : memref<1x!tpu.dma_semaphore, #tpu.memory_space<semaphore_mem>> -> memref<!tpu.dma_semaphore, #tpu.memory_space<semaphore_mem>>
    tpu.enqueue_dma source(%4 : memref<1x1024xf32, #tpu.memory_space<any>>) target(%5 : memref<1x1024xf32, #tpu.memory_space<any>>) target_semaphore(%7 : memref<!tpu.dma_semaphore, #tpu.memory_space<semaphore_mem>>)
    %c0_i32_8 = arith.constant 0 : i32
    %c0_i32_9 = arith.constant 0 : i32
    %c0_i32_10 = arith.constant 0 : i32
    %8 = tpu.memref_slice %arg0[%c0_i32_9, %c0_i32_10] : memref<2x1024xf32, #tpu.memory_space<any>> -> memref<1x1024xf32, #tpu.memory_space<any>>
    %c0_i32_11 = arith.constant 0 : i32
    %c0_i32_12 = arith.constant 0 : i32
    %9 = tpu.memref_slice %arg1[%c0_i32_11, %c0_i32_12] : memref<2x1024xf32, #tpu.memory_space<any>> -> memref<1x1024xf32, #tpu.memory_space<any>>
    %10 = tpu.memref_slice %arg2[%c0_i32_8] : memref<2x!tpu.dma_semaphore, #tpu.memory_space<semaphore_mem>> -> memref<1x!tpu.dma_semaphore, #tpu.memory_space<semaphore_mem>>
    %11 = tpu.memref_squeeze %10 : memref<1x!tpu.dma_semaphore, #tpu.memory_space<semaphore_mem>> -> memref<!tpu.dma_semaphore, #tpu.memory_space<semaphore_mem>>
    tpu.wait_dma2 semaphore(%11 : memref<!tpu.dma_semaphore, #tpu.memory_space<semaphore_mem>>) src(%8 : memref<1x1024xf32, #tpu.memory_space<any>>) dst(%9 : memref<1x1024xf32, #tpu.memory_space<any>>)
    %c1_i32_13 = arith.constant 1 : i32
    %c1_i32_14 = arith.constant 1 : i32
    %c0_i32_15 = arith.constant 0 : i32
    %12 = tpu.memref_slice %arg0[%c1_i32_14, %c0_i32_15] : memref<2x1024xf32, #tpu.memory_space<any>> -> memref<1x1024xf32, #tpu.memory_space<any>>
    %c1_i32_16 = arith.constant 1 : i32
    %c0_i32_17 = arith.constant 0 : i32
    %13 = tpu.memref_slice %arg1[%c1_i32_16, %c0_i32_17] : memref<2x1024xf32, #tpu.memory_space<any>> -> memref<1x1024xf32, #tpu.memory_space<any>>
    %14 = tpu.memref_slice %arg2[%c1_i32_13] : memref<2x!tpu.dma_semaphore, #tpu.memory_space<semaphore_mem>> -> memref<1x!tpu.dma_semaphore, #tpu.memory_space<semaphore_mem>>
    %15 = tpu.memref_squeeze %14 : memref<1x!tpu.dma_semaphore, #tpu.memory_space<semaphore_mem>> -> memref<!tpu.dma_semaphore, #tpu.memory_space<semaphore_mem>>
    tpu.wait_dma2 semaphore(%15 : memref<!tpu.dma_semaphore, #tpu.memory_space<semaphore_mem>>) src(%12 : memref<1x1024xf32, #tpu.memory_space<any>>) dst(%13 : memref<1x1024xf32, #tpu.memory_space<any>>)
    return
  }
}

</mosaic_0001>

<bundles_post_ra>
// kernel: tpu_custom_call.1
= control target key start
LH: loop header
LB: loop body
LE: loop exit
PB: predicated region body
PF: predicated region fallthrough
CT: control target
= control target key end

     0   :  { %s78_s6 = smov 32   ;;  %s79_s7 = smov 1   ;;  %s107_s0 = inlined_call_operand.hbm [shape: f32[2,1024], index: 0, kind: input, shape index: {}]   ;;  %s108_s1 = inlined_call_operand.hbm [shape: f32[2,1024], index: 1, kind: output, shape index: {}]  }
   0x1   :  { %18 = sst [smem:[#allocation4]] %s78_s6  ;;  %s80_s8 = smov [#allocation2]  }
   0x2   :  { %20 = sst [smem:[#allocation4 + $0x1]] %s78_s6  ;;  %s81_s9 = smov [#allocation3]  }
   0x3   :  { %22 = sst [smem:[#allocation4 + $0x2]] %s79_s7  ;;  %s82_s10 = smov 0  }
   0x4   :  { %24 = dma.general %s107_s0, 128, %s108_s1, %s80_s8, %s81_s9, [#allocation4], %s82_s10, 0  }
   0x5   :  { %40 = sst [smem:[#allocation6]] %s78_s6  ;;  %s25_s17 = scalar_lea.hbm %s107_s0, 16 }
   0x6   :  { %42 = sst [smem:[#allocation6 + $0x1]] %s78_s6  ;;  %s26_s20 = scalar_lea.hbm %s108_s1, 16 }
   0x7   :  { %44 = sst [smem:[#allocation6 + $0x2]] %s79_s7  ;;  %s83_s21 = smov [#allocation2 + $0x1]  }
   0x8   :  { %s84_s22 = smov [#allocation5]  }
   0x9   :  { %46 = dma.general %s25_s17, 128, %s26_s20, %s83_s21, %s84_s22, [#allocation6], %s82_s10, 0  }
   0xa   :  { %74 = dma.done.wait [#allocation2], 128 }
   0xb   :  { %75 = vsyncadd [#allocation2], 4294967168 }
   0xc   :  { %76 = dma.done.wait [#allocation2 + $0x1], 128 }
   0xd   :  { %77 = vsyncadd [#allocation2 + $0x1], 4294967168 }
   0xe   :  { %52 = vsyncmov [#allocation2] }
  0x11   :  { %s53_s23 = vpop.sfrf %52 }
  0x12   :  { %p65_p0 = scmp.ne.s32.totalorder %s53_s23, 0 }
  0x14   :  { %57 = shalt.err (%p65_p0)  }
  0x15   :  { %59 = vsyncmov [#allocation2 + $0x1] }
  0x18   :  { %s60_s24 = vpop.sfrf %59 }
  0x19   :  { %p66_p1 = scmp.ne.s32.totalorder %s60_s24, 0 }
  0x1b   :  { %64 = shalt.err (%p66_p1)  }

</bundles_post_ra>
